<compile_context>
chip_gen: v5e
topology: v5e:2x2
jax: 0.10.0
libtpu: 0.0.40
codegen_flags: <defaults>
</compile_context>

<pallas_src>
import functools

import jax
import jax.numpy as jnp
import numpy as np
from jax.experimental import pallas as pl
from jax.experimental.pallas import tpu as pltpu


# ----------------------------- Pallas kernel ---------------------------------
def _sepconv_kernel(w_ref, p_ref, o_ref):
    # w_ref: (Cout, K_pad)  fused (deepwise o pointwise) weight, bias folded into col kk.
    # p_ref: (K_pad, tm)    im2col patch tile (K padded to 128-multiple, +1 ones row).
    # o_ref: (Cout, tm)     lane-dense output tile.
    o_ref[...] = jnp.dot(
        w_ref[...], p_ref[...], preferred_element_type=jnp.float32
    ).astype(o_ref.dtype)


# ------------------------------ host helpers ----------------------------------
def _im2col_t(x, k, stride, ho, wo):
    """x: (N, C, H, W) -> transposed patches (C*k*k, N*Ho*Wo), VALID padding.

    Row index is row-major over (c, kh, kw) to match torch's OIHW weight flattening;
    column index is row-major over (n, ho, wo)."""
    n, c, _, _ = x.shape
    taps = []
    for i in range(k):
        for j in range(k):
            taps.append(x[:, :, i:i + stride * ho:stride, j:j + stride * wo:stride])
    p = jnp.stack(taps, axis=0).reshape(k, k, n, c, ho, wo)
    p = p.transpose(3, 0, 1, 2, 4, 5)            # (C, k, k, N, Ho, Wo)
    return p.reshape(c * k * k, n * ho * wo)


def _pick_tile_m(m, k_pad, cout, in_bytes):
    """Choose the lane (M) tile: big (>=512 when possible), multiple of 128, VMEM-safe."""
    budget = 32 * 1024 * 1024                    # fits v7x 64 MiB VMEM with headroom
    per_row = 2 * k_pad * in_bytes + 2 * cout * 4    # dbl-buffered patch + output tiles
    tm = (budget - cout * k_pad * in_bytes) // per_row
    tm = max(128, min(2048, (tm // 128) * 128))
    m128 = pl.cdiv(m, 128) * 128
    tm = min(tm, m128)                           # don't tile beyond the problem
    if m128 >= 256:                              # keep >=2 grid steps (v7x: 2 TensorCores)
        tm = min(tm, max(128, ((m128 // 2) // 128) * 128))
    return tm


# ------------------------------- public op ------------------------------------
@functools.partial(jax.jit, static_argnames=("kernel_size", "stride", "compute_dtype"))
def separable_conv2d(x, w_dw, b_dw, w_pw, b_pw, *, kernel_size, stride,
                     compute_dtype=jnp.float32):
    """Matches torch: Conv2d(Cin,Cin,k,stride) -> Conv2d(Cin,Cout,1), VALID padding.

    x    : (N, Cin, H, W)   NCHW
    w_dw : (Cin, Cin, k, k) torch OIHW   b_dw : (Cin,)
    w_pw : (Cout, Cin, 1, 1)             b_pw : (Cout,)
    returns (N, Cout, Ho, Wo) with Ho = (H-k)//stride + 1.
    compute_dtype=jnp.bfloat16 feeds the MXU in bf16 (f32 accumulation) on v5e/v6e/v7x.
    """
    n, cin, h, w = x.shape
    cout = w_pw.shape[0]
    k = kernel_size
    ho = (h - k) // stride + 1
    wo = (w - k) // stride + 1
    m = n * ho * wo
    kk = cin * k * k

    # ---- fuse the two convs (exact: no nonlinearity in between), in f32 ----
    w_pw2 = w_pw.reshape(cout, cin).astype(jnp.float32)
    w_f = w_pw2 @ w_dw.reshape(cin, kk).astype(jnp.float32)             # (Cout, Cin*k*k)
    b_f = w_pw2 @ b_dw.astype(jnp.float32) + b_pw.astype(jnp.float32)   # (Cout,)

    # ---- transposed im2col + pad K to 128 multiple, fold bias via ones row ----
    k_pad = pl.cdiv(kk + 1, 128) * 128
    in_bytes = np.dtype(compute_dtype).itemsize
    tm = _pick_tile_m(m, k_pad, cout, in_bytes)
    m_pad = pl.cdiv(m, tm) * tm

    patches = _im2col_t(x.astype(jnp.float32), k, stride, ho, wo)        # (kk, m)
    p_aug = jnp.concatenate([patches, jnp.ones((1, m), jnp.float32)], axis=0)
    p_aug = jnp.pad(p_aug, ((0, k_pad - kk - 1), (0, m_pad - m)))        # (K_pad, M_pad)
    w_aug = jnp.concatenate([w_f, b_f[:, None]], axis=1)                 # (Cout, kk+1)
    w_aug = jnp.pad(w_aug, ((0, 0), (0, k_pad - kk - 1)))                # (Cout, K_pad)

    p_aug = p_aug.astype(compute_dtype)
    w_aug = w_aug.astype(compute_dtype)

    grid = (m_pad // tm,)
    cost = pl.CostEstimate(
        flops=2 * m_pad * k_pad * cout,
        transcendentals=0,
        bytes_accessed=(p_aug.size * p_aug.dtype.itemsize
                        + w_aug.size * w_aug.dtype.itemsize
                        + m_pad * cout * 4),
    )

    out_t = pl.pallas_call(
        _sepconv_kernel,
        out_shape=jax.ShapeDtypeStruct((cout, m_pad), jnp.float32),
        grid_spec=pltpu.PrefetchScalarGridSpec(
            num_scalar_prefetch=0,
            grid=grid,
            in_specs=[
                pl.BlockSpec((cout, k_pad), lambda i: (0, 0)),   # resident fused weight
                pl.BlockSpec((k_pad, tm), lambda i: (0, i)),     # lane-dense patch tile
            ],
            out_specs=pl.BlockSpec((cout, tm), lambda i: (0, i)),  # lane-dense output
        ),
        compiler_params=pltpu.CompilerParams(
            dimension_semantics=("parallel",),
            vmem_limit_bytes=48 * 1024 * 1024,
        ),
        cost_estimate=cost,
    )(w_aug, p_aug)

    out = out_t[:, :m].reshape(cout, n, ho, wo).transpose(1, 0, 2, 3)    # -> NCHW
    return out.astype(x.dtype)


# --------------------------------- demo --------------------------------------
if __name__ == "__main__":
    # Module config (small, consistent with SeparableConv2d(__init__) shapes).
    batch, in_channels, out_channels = 2, 4, 8
    spatial, kernel_size, stride = 16, 3, 2

    key = jax.random.PRNGKey(0)
    kx, k1, k2, k3, k4 = jax.random.split(key, 5)

    x = jax.random.normal(kx, (batch, in_channels, spatial, spatial), jnp.float32)
    w_dw = jax.random.normal(k1, (in_channels, in_channels, kernel_size, kernel_size),
                             jnp.float32) * 0.1
    b_dw = jax.random.normal(k2, (in_channels,), jnp.float32) * 0.1
    w_pw = jax.random.normal(k3, (out_channels, in_channels, 1, 1), jnp.float32) * 0.1
    b_pw = jax.random.normal(k4, (out_channels,), jnp.float32) * 0.1

    # f32 path (exact check against XLA reference).
    out = separable_conv2d(x, w_dw, b_dw, w_pw, b_pw,
                           kernel_size=kernel_size, stride=stride)
    out = jax.block_until_ready(out)

    # Reference: same semantics as the torch module (dense conv, then 1x1 conv).
    ref = jax.lax.conv_general_dilated(
        x, w_dw, (stride, stride), "VALID",
        dimension_numbers=("NCHW", "OIHW", "NCHW")) + b_dw[None, :, None, None]
    ref = jax.lax.conv_general_dilated(
        ref, w_pw, (1, 1), "VALID",
        dimension_numbers=("NCHW", "OIHW", "NCHW")) + b_pw[None, :, None, None]

    assert out.shape == ref.shape, (out.shape, ref.shape)
    np.testing.assert_allclose(np.asarray(out), np.asarray(ref), rtol=1e-4, atol=1e-4)

    # bf16 MXU path (recommended for v5e/v6e/v7x); loose tolerance due to bf16 inputs.
    out_bf16 = separable_conv2d(x, w_dw, b_dw, w_pw, b_pw,
                                kernel_size=kernel_size, stride=stride,
                                compute_dtype=jnp.bfloat16)
    out_bf16 = jax.block_until_ready(out_bf16)
    np.testing.assert_allclose(np.asarray(out_bf16), np.asarray(ref),
                               rtol=5e-2, atol=2e-2)

    print("KERNEL_OK")
</pallas_src>

<mosaic_0001>
module attributes {stable_mosaic.version = 11 : i64} {
  func.func @_sepconv_kernel(%arg0: i32, %arg1: memref<8x128xf32, #tpu.memory_space<vmem>>, %arg2: memref<128x128xf32, #tpu.memory_space<vmem>>, %arg3: memref<8x128xf32, #tpu.memory_space<vmem>>) attributes {dimension_semantics = [#tpu.dimension_semantics<parallel>], iteration_bounds = array<i64: 1>, scalar_prefetch = 0 : i64, scratch_operands = 0 : i64, tpu.core_type = #tpu.core_type<tc>, window_params = [{pipeline_mode = #tpu.pipeline_mode<synchronous>, transform_indices = @transform_0, window_bounds = array<i64: 8, 128>}, {transform_indices = @transform_1, window_bounds = array<i64: 128, 128>}, {transform_indices = @transform_2, window_bounds = array<i64: 8, 128>}]} {
    %c0 = arith.constant 0 : index
    %c0_0 = arith.constant 0 : index
    %0 = vector.load %arg1[%c0, %c0_0] : memref<8x128xf32, #tpu.memory_space<vmem>>, vector<8x128xf32>
    %c0_1 = arith.constant 0 : index
    %c0_2 = arith.constant 0 : index
    %1 = vector.load %arg2[%c0_1, %c0_2] : memref<128x128xf32, #tpu.memory_space<vmem>>, vector<128x128xf32>
    %cst = arith.constant dense<0.000000e+00> : vector<8x128xf32>
    %2 = tpu.matmul %0, %1, %cst {dimension_numbers = #tpu.dot_dimension_numbers<[1], [0], [0], [1], [0, 0, 1, 1], [], []>} : vector<8x128xf32>, vector<128x128xf32>, vector<8x128xf32> -> vector<8x128xf32>
    %c0_3 = arith.constant 0 : index
    %c0_4 = arith.constant 0 : index
    %3 = vector.load %arg3[%c0_3, %c0_4] : memref<8x128xf32, #tpu.memory_space<vmem>>, vector<8x128xf32>
    tpu.vector_store %arg3[%c0_3, %c0_4], %2 {strides = array<i32>} : memref<8x128xf32, #tpu.memory_space<vmem>>, vector<8x128xf32>,
    return
  }
  func.func @transform_0(%arg0: i32) -> (i32, i32) {
    %c0_i32 = arith.constant 0 : i32
    %c0_i32_0 = arith.constant 0 : i32
    %c0_i32_1 = arith.constant 0 : i32
    return %c0_i32, %c0_i32_0 : i32, i32
  }
  func.func @transform_1(%arg0: i32) -> (i32, i32) {
    %c0_i32 = arith.constant 0 : i32
    %c0_i32_0 = arith.constant 0 : i32
    return %c0_i32, %arg0 : i32, i32
  }
  func.func @transform_2(%arg0: i32) -> (i32, i32) {
    %c0_i32 = arith.constant 0 : i32
    %c0_i32_0 = arith.constant 0 : i32
    return %c0_i32, %arg0 : i32, i32
  }
}

</mosaic_0001>

<bundles_post_ra>
// kernel: separable_conv2d.1
= control target key start
LH: loop header
LB: loop body
LE: loop exit
PB: predicated region body
PF: predicated region fallthrough
CT: control target
= control target key end

     0   :  { %s122_s1 = inlined_call_operand.vmem [shape: f32[128,128], index: 1, kind: input, shape index: {}]   ;;  %s123_s0 = inlined_call_operand.vmem [shape: f32[8,128], index: 0, kind: input, shape index: {}]   ;;  %s124_s2 = inlined_call_operand.vmem [shape: f32[8,128], index: 2, kind: output, shape index: {}]  }
   0x1   :  { %v27_v0 = vld [vmem:[%s122_s1 + $0x78] sm:$0xff]  ;;  %v26_v1 = vld [vmem:[%s122_s1 + $0x70] sm:$0xff]  ;;  %v25_v2 = vld [vmem:[%s122_s1 + $0x68] sm:$0xff] }
   0x2   :  { %28 = vmatpush.msra.mxu0 %v27_v0  ;;  %v24_v3 = vld [vmem:[%s122_s1 + $0x60] sm:$0xff]  ;;  %v23_v4 = vld [vmem:[%s122_s1 + $0x58] sm:$0xff]  ;;  %v22_v5 = vld [vmem:[%s122_s1 + $0x50] sm:$0xff] }
   0x3   :  { %v21_v6 = vld [vmem:[%s122_s1 + $0x48] sm:$0xff]  ;;  %v20_v7 = vld [vmem:[%s122_s1 + $0x40] sm:$0xff]  ;;  %v19_v8 = vld [vmem:[%s122_s1 + $0x38] sm:$0xff] }
   0x4   :  { %29 = vmatpush.msra.mxu0 %v26_v1  ;;  %v18_v9 = vld [vmem:[%s122_s1 + $0x30] sm:$0xff]  ;;  %v17_v10 = vld [vmem:[%s122_s1 + $0x28] sm:$0xff]  ;;  %v16_v11 = vld [vmem:[%s122_s1 + $0x20] sm:$0xff] }
   0x5   :  { %v15_v12 = vld [vmem:[%s122_s1 + $0x18] sm:$0xff]  ;;  %v14_v13 = vld [vmem:[%s122_s1 + $0x10] sm:$0xff]  ;;  %v13_v14 = vld [vmem:[%s122_s1 + $0x8] sm:$0xff] }
   0x6   :  { %30 = vmatpush.msra.mxu0 %v25_v2  ;;  %v12_v15 = vld [vmem:[%s122_s1] sm:$0xff] }
   0x7   :  { %v11_v16 = vld [vmem:[%s123_s0] sm:$0xff] }
   0x8   :  { %31 = vmatpush.msra.mxu0 %v24_v3 }
   0xa   :  { %32 = vmatpush.msra.mxu0 %v23_v4 }
   0xc   :  { %33 = vmatpush.msra.mxu0 %v22_v5 }
   0xe   :  { %34 = vmatpush.msra.mxu0 %v21_v6 }
  0x10   :  { %35 = vmatpush.msra.mxu0 %v20_v7 }
  0x12   :  { %36 = vmatpush.msra.mxu0 %v19_v8 }
  0x14   :  { %37 = vmatpush.msra.mxu0 %v18_v9 }
  0x16   :  { %38 = vmatpush.msra.mxu0 %v17_v10 }
  0x18   :  { %39 = vmatpush.msra.mxu0 %v16_v11 }
  0x1a   :  { %40 = vmatpush.msra.mxu0 %v15_v12 }
  0x1c   :  { %41 = vmatpush.msra.mxu0 %v14_v13 }
  0x1e   :  { %42 = vmatpush.msra.mxu0 %v13_v14 }
  0x20   :  { %43 = vmatpush.msra.mxu0 %v12_v15 }
  0x21   :  { %44 = vmatmul.f32.vlgmr.msra.gmra.mxu0 %v11_v16 }
  0x9e   :  { %v45_v17 = vpop.f32.mrf.mxu0 }
  0x9f   :  { %48 = vst [vmem:[%s124_s2] sm:$0xff] %v45_v17 }

</bundles_post_ra>
